<compile_context>
chip_gen: v6e
topology: v6e:2x2x1
jax: 0.10.0
libtpu: 0.0.40
codegen_flags: <defaults>
</compile_context>

<pallas_src>
import functools

import jax
import jax.numpy as jnp
from jax.experimental import pallas as pl
from jax.experimental.pallas import tpu as pltpu


def _lane_fold(x):
    """Reduce the trailing (lane) axis down to 128 lanes with a halving tree.

    Uses only 128-aligned static slices + VPU adds, so no per-tile cross-lane
    XLU reduce is emitted.  Requires the trailing extent to be a power of two
    multiple of 128 (guaranteed by the wrapper's tile selection).
    """
    while x.shape[-1] > 128:
        half = x.shape[-1] // 2
        x = x[..., :half] + x[..., half:]
    return x


def _dice_ce_partial_kernel(logits_ref, targets_ref,
                            inter_ref, card_ref, ce_ref,
                            inter_acc, card_acc, ce_acc, *, has_pad):
    """Accumulates per-(batch, class) partial sums over spatial tiles.

    logits_ref:  (N, C, TP) native dtype (f32/bf16)
    targets_ref: (N, TP)    int8/int16/int32 (padded pixels are -1)
    inter/card_ref (out): (1, N, C) f32 per-chunk partials
    ce_ref (out):         (1, N, 1) f32 per-chunk partial
    *_acc: lane-width VMEM accumulators (N, C, 128) / (N, 1, 128)
    """
    t = pl.program_id(1)
    nt = pl.num_programs(1)

    @pl.when(t == 0)
    def _init():
        inter_acc[...] = jnp.zeros_like(inter_acc)
        card_acc[...] = jnp.zeros_like(card_acc)
        ce_acc[...] = jnp.zeros_like(ce_acc)

    logits = logits_ref[...].astype(jnp.float32)          # (N, C, TP)
    tgt = targets_ref[...].astype(jnp.int32)              # (N, TP)
    n, c, tp = logits.shape

    # Boolean class mask, reused everywhere (no 3x f32 one-hot materialization).
    class_ids = jax.lax.broadcasted_iota(jnp.int32, (n, c, tp), 1)
    mask = class_ids == tgt[:, None, :]                   # (N, C, TP) bool

    # Numerically-stable softmax over the class (sublane) axis.
    m = jnp.max(logits, axis=1, keepdims=True)            # (N, 1, TP)
    shifted = logits - m
    exp = jnp.exp(shifted)
    sumexp = jnp.sum(exp, axis=1, keepdims=True)          # (N, 1, TP)

    # EUP approx reciprocal + one Newton-Raphson step (keeps ~f32 accuracy
    # while moving the divide off the VALU slot).
    r = pl.reciprocal(sumexp, approx=True)
    r = r * (2.0 - sumexp * r)
    probs = exp * r                                        # (N, C, TP)

    # Cross-entropy per pixel: log(sumexp) - shifted[target]; only a cheap
    # sublane reduce over C, no (N, C, TP) log_probs tensor.
    tgt_shifted = jnp.sum(jnp.where(mask, shifted, 0.0), axis=1, keepdims=True)
    ce_pix = jnp.log(sumexp) - tgt_shifted                 # (N, 1, TP)

    one_hot = jnp.where(mask, 1.0, 0.0)                    # single f32 convert

    if has_pad:
        # Padded pixels (target == -1) must not contribute to card / CE.
        valid = (tgt >= 0)[:, None, :]                     # (N, 1, TP)
        probs = jnp.where(valid, probs, 0.0)
        ce_pix = jnp.where(valid, ce_pix, 0.0)

    inter_contrib = jnp.where(mask, probs, 0.0)            # (N, C, TP)
    card_contrib = probs + one_hot                         # (N, C, TP)

    # Lane-width accumulation: pure VPU adds; XLU reduce deferred to finalize.
    inter_acc[...] += _lane_fold(inter_contrib)
    card_acc[...] += _lane_fold(card_contrib)
    ce_acc[...] += _lane_fold(ce_pix)

    @pl.when(t == nt - 1)
    def _finalize():
        inter_ref[0] = jnp.sum(inter_acc[...], axis=-1)    # (N, C)
        card_ref[0] = jnp.sum(card_acc[...], axis=-1)      # (N, C)
        ce_ref[0] = jnp.sum(ce_acc[...], axis=-1)          # (N, 1)


def _round_up(x, m):
    return ((x + m - 1) // m) * m


def _tpu_vmem_and_cores():
    """Best-effort query of per-core VMEM capacity and TensorCores per chip."""
    vmem_cap = 64 * 1024 * 1024            # conservative (v7x-sized) fallback
    try:
        vmem_cap = int(pltpu.get_tpu_info().vmem_capacity_bytes)
    except Exception:
        pass
    # v5e/v6e: 1 TC with 128 MiB VMEM; v7x: 2 TCs with 64 MiB each.
    n_cores = 1 if vmem_cap >= 128 * 1024 * 1024 else 2
    return vmem_cap, n_cores


def _pick_spatial_tile(P, N, C, logit_itemsize, tgt_itemsize, step_budget_bytes):
    """Largest power-of-two lane tile whose per-grid-step working set fits.

    Per-pixel bytes = 2x double-buffered native inputs (logits + targets)
    + ~8 f32 (N, C)-wide compute temporaries (upcast, shifted, exp, probs,
    mask selects, inter/card contributions).
    """
    per_pixel = 2 * (N * C * logit_itemsize + N * tgt_itemsize) + 8 * N * C * 4
    max_lanes = max(128, step_budget_bytes // per_pixel)
    tile = 128
    while tile * 2 <= max_lanes and tile < 32768:
        tile *= 2
    # Don't exceed the power-of-two cover of P (avoids padding waste on small
    # inputs) but never drop below 128 lanes.
    p_cover = 128
    while p_cover < P:
        p_cover *= 2
    return min(tile, p_cover)


def dice_ce_loss(logits_nchw, targets_nhw, *, a=0.5, b=0.5, smooth=1e-6,
                 tile_p=None, logits_pipeline_depth=None):
    """Pallas TPU implementation of DiceCELoss.forward.

    logits_nchw: (N, C, H, W) float (any float dtype; kept native over HBM)
    targets_nhw: (N, H, W) int
    logits_pipeline_depth: optional deeper input pipelining (e.g. 3 on v5e
        with f32 logits if DMA is exposed); default keeps 2-deep buffering.
    returns scalar float32 loss = a * CE + b * DiceLoss.
    """
    N, C, H, W = logits_nchw.shape
    # TODO(synk): F.interpolate (bilinear resize) path when logits/targets
    # spatial sizes differ is not implemented; shapes are assumed to match.
    assert targets_nhw.shape == (N, H, W)
    P = H * W

    # NCHW -> (N, C, H*W): contiguous reshape, no HBM-materialized transpose.
    logits = logits_nchw.reshape(N, C, P)

    # Shrink HBM target traffic: narrowest signed dtype holding [-1, C).
    if C <= 127:
        tgt_dtype = jnp.int8
    elif C <= 32767:
        tgt_dtype = jnp.int16
    else:
        tgt_dtype = jnp.int32
    targets = targets_nhw.reshape(N, P).astype(tgt_dtype)

    vmem_cap, n_cores = _tpu_vmem_and_cores()
    if vmem_cap >= 128 * 1024 * 1024:      # v5e / v6e: plenty of VMEM headroom
        vmem_limit = 100 * 1024 * 1024
        step_budget = 64 * 1024 * 1024
    else:                                  # v7x (or unknown): 64 MiB per core
        vmem_limit = 48 * 1024 * 1024
        step_budget = 32 * 1024 * 1024

    if tile_p is None:
        tile_p = _pick_spatial_tile(P, N, C, logits.dtype.itemsize,
                                    targets.dtype.itemsize, step_budget)
    assert tile_p >= 128 and (tile_p & (tile_p - 1)) == 0, \
        "tile_p must be a power of two >= 128"

    num_tiles = (P + tile_p - 1) // tile_p
    # 2-way chunk split only on 2-TensorCore chips (v7x); guaranteed even by
    # rounding the tile count up (padded tiles are masked in-kernel).
    n_chunks = 2 if (n_cores >= 2 and num_tiles >= 2) else 1
    num_tiles = _round_up(num_tiles, n_chunks)
    tiles_per_chunk = num_tiles // n_chunks

    P_pad = num_tiles * tile_p
    has_pad = P_pad != P
    if has_pad:
        logits = jnp.pad(logits, ((0, 0), (0, 0), (0, P_pad - P)))
        targets = jnp.pad(targets, ((0, 0), (0, P_pad - P)), constant_values=-1)

    logits_spec_kwargs = {}
    if logits_pipeline_depth is not None:
        logits_spec_kwargs["pipeline_mode"] = pl.Buffered(logits_pipeline_depth)

    in_specs = [
        pl.BlockSpec((N, C, tile_p),
                     lambda ci, ti: (0, 0, ci * tiles_per_chunk + ti),
                     **logits_spec_kwargs),
        pl.BlockSpec((N, tile_p),
                     lambda ci, ti: (0, ci * tiles_per_chunk + ti)),
    ]

    part_nc = jax.ShapeDtypeStruct((n_chunks, N, C), jnp.float32)
    part_n1 = jax.ShapeDtypeStruct((n_chunks, N, 1), jnp.float32)
    out_specs = (
        pl.BlockSpec((1, N, C), lambda ci, ti: (ci, 0, 0)),
        pl.BlockSpec((1, N, C), lambda ci, ti: (ci, 0, 0)),
        pl.BlockSpec((1, N, 1), lambda ci, ti: (ci, 0, 0)),
    )

    kernel = functools.partial(_dice_ce_partial_kernel, has_pad=has_pad)

    inter_p, card_p, ce_p = pl.pallas_call(
        kernel,
        out_shape=(part_nc, part_nc, part_n1),
        grid_spec=pltpu.PrefetchScalarGridSpec(
            num_scalar_prefetch=0,
            grid=(n_chunks, tiles_per_chunk),
            in_specs=in_specs,
            out_specs=out_specs,
            scratch_shapes=[
                pltpu.VMEM((N, C, 128), jnp.float32),   # intersection
                pltpu.VMEM((N, C, 128), jnp.float32),   # cardinality
                pltpu.VMEM((N, 1, 128), jnp.float32),   # cross-entropy
            ],
        ),
        compiler_params=pltpu.CompilerParams(
            dimension_semantics=("parallel", "arbitrary"),
            vmem_limit_bytes=vmem_limit,
        ),
    )(logits, targets)

    # Tiny O(N*C) epilogue: combine per-chunk partials into the scalar loss.
    intersection = jnp.sum(inter_p, axis=0)             # (N, C)
    cardinality = jnp.sum(card_p, axis=0)               # (N, C)
    ce_loss = jnp.sum(ce_p) / jnp.float32(N * P)        # true-pixel denominator
    dice_score = (2.0 * intersection + smooth) / (cardinality + smooth)
    dice_loss = 1.0 - jnp.mean(dice_score)
    return a * ce_loss + b * dice_loss


def _reference_dice_ce(logits_nchw, targets_nhw, a=0.5, b=0.5, smooth=1e-6):
    """Pure-JAX reference mirroring the PyTorch module, for verification."""
    logits = logits_nchw.astype(jnp.float32)
    N, C, H, W = logits.shape
    log_probs = jax.nn.log_softmax(logits, axis=1)                 # (N,C,H,W)
    one_hot = jax.nn.one_hot(targets_nhw, C, dtype=jnp.float32)    # (N,H,W,C)
    one_hot = jnp.transpose(one_hot, (0, 3, 1, 2))                 # (N,C,H,W)
    ce = -jnp.sum(one_hot * log_probs, axis=1)                     # (N,H,W)
    ce_loss = jnp.mean(ce)
    probs = jax.nn.softmax(logits, axis=1)
    inter = jnp.sum(probs * one_hot, axis=(2, 3))                  # (N,C)
    card = jnp.sum(probs + one_hot, axis=(2, 3))                   # (N,C)
    dice = (2.0 * inter + smooth) / (card + smooth)
    dice_loss = 1.0 - jnp.mean(dice)
    return a * ce_loss + b * dice_loss


if __name__ == "__main__":
    key = jax.random.PRNGKey(0)
    k1, k2, k3, k4, k5, k6 = jax.random.split(key, 6)

    # Case 1: small shape, auto-selected tile (single grid step, no padding).
    N, C, H, W = 2, 4, 16, 16
    logits = jax.random.normal(k1, (N, C, H, W), dtype=jnp.float32)
    targets = jax.random.randint(k2, (N, H, W), 0, C, dtype=jnp.int32)
    loss = jax.block_until_ready(dice_ce_loss(logits, targets, a=0.5, b=0.5))
    ref = jax.block_until_ready(_reference_dice_ce(logits, targets, a=0.5, b=0.5))
    assert jnp.allclose(loss, ref, rtol=1e-5, atol=1e-5), (loss, ref)

    # Case 2: forces the multi-tile pipelined reduction (and the 2-chunk
    # parallel split on 2-core chips).
    N2, C2, H2, W2 = 2, 4, 32, 64
    logits2 = jax.random.normal(k3, (N2, C2, H2, W2), dtype=jnp.float32)
    targets2 = jax.random.randint(k4, (N2, H2, W2), 0, C2, dtype=jnp.int32)
    loss2 = jax.block_until_ready(
        dice_ce_loss(logits2, targets2, a=0.5, b=0.5, tile_p=256))
    ref2 = jax.block_until_ready(
        _reference_dice_ce(logits2, targets2, a=0.5, b=0.5))
    assert jnp.allclose(loss2, ref2, rtol=1e-5, atol=1e-5), (loss2, ref2)

    # Case 3: spatial size not divisible by the tile (exercises the padding /
    # masking path) with an odd class count.
    N3, C3, H3, W3 = 2, 3, 20, 20
    logits3 = jax.random.normal(k5, (N3, C3, H3, W3), dtype=jnp.float32)
    targets3 = jax.random.randint(k6, (N3, H3, W3), 0, C3, dtype=jnp.int32)
    loss3 = jax.block_until_ready(
        dice_ce_loss(logits3, targets3, a=0.5, b=0.5, tile_p=128))
    ref3 = jax.block_until_ready(
        _reference_dice_ce(logits3, targets3, a=0.5, b=0.5))
    assert jnp.allclose(loss3, ref3, rtol=1e-5, atol=1e-5), (loss3, ref3)

    print("KERNEL_OK")
</pallas_src>

<mosaic_0001>
module attributes {stable_mosaic.version = 11 : i64} {
  func.func @_dice_ce_partial_kernel(%arg0: i32, %arg1: i32, %arg2: memref<2x4x256xf32, #tpu.memory_space<vmem>>, %arg3: memref<2x256xi8, #tpu.memory_space<vmem>>, %arg4: memref<1x2x4xf32, #tpu.memory_space<vmem>>, %arg5: memref<1x2x4xf32, #tpu.memory_space<vmem>>, %arg6: memref<1x2x1xf32, #tpu.memory_space<vmem>>, %arg7: memref<2x4x128xf32, #tpu.memory_space<vmem>>, %arg8: memref<2x4x128xf32, #tpu.memory_space<vmem>>, %arg9: memref<2x1x128xf32, #tpu.memory_space<vmem>>) attributes {dimension_semantics = [#tpu.dimension_semantics<parallel>, #tpu.dimension_semantics<arbitrary>], iteration_bounds = array<i64: 1, 1>, scalar_prefetch = 0 : i64, scratch_operands = 3 : i64, tpu.core_type = #tpu.core_type<tc>, window_params = [{transform_indices = @transform_0, window_bounds = array<i64: 2, 4, 256>}, {transform_indices = @transform_1, window_bounds = array<i64: 2, 256>}, {transform_indices = @transform_2, window_bounds = array<i64: 1, 2, 4>}, {transform_indices = @transform_3, window_bounds = array<i64: 1, 2, 4>}, {transform_indices = @transform_4, window_bounds = array<i64: 1, 2, 1>}]} {
    %c0_i32 = arith.constant 0 : i32
    %0 = arith.cmpi eq, %arg1, %c0_i32 : i32
    %1 = arith.extui %0 : i1 to i32
    %c0_i32_0 = arith.constant 0 : i32
    %2 = arith.cmpi ne, %1, %c0_i32_0 : i32
    scf.if %2 {
      %cst_32 = arith.constant 0.000000e+00 : f32
      %57 = vector.broadcast %cst_32 : f32 to vector<2x4x128xf32>
      %c0_33 = arith.constant 0 : index
      %c0_34 = arith.constant 0 : index
      %c0_35 = arith.constant 0 : index
      %58 = vector.load %arg7[%c0_33, %c0_34, %c0_35] : memref<2x4x128xf32, #tpu.memory_space<vmem>>, vector<2x4x128xf32>
      tpu.vector_store %arg7[%c0_33, %c0_34, %c0_35], %57 {strides = array<i32>} : memref<2x4x128xf32, #tpu.memory_space<vmem>>, vector<2x4x128xf32>,
      %cst_36 = arith.constant 0.000000e+00 : f32
      %59 = vector.broadcast %cst_36 : f32 to vector<2x4x128xf32>
      %c0_37 = arith.constant 0 : index
      %c0_38 = arith.constant 0 : index
      %c0_39 = arith.constant 0 : index
      %60 = vector.load %arg8[%c0_37, %c0_38, %c0_39] : memref<2x4x128xf32, #tpu.memory_space<vmem>>, vector<2x4x128xf32>
      tpu.vector_store %arg8[%c0_37, %c0_38, %c0_39], %59 {strides = array<i32>} : memref<2x4x128xf32, #tpu.memory_space<vmem>>, vector<2x4x128xf32>,
      %cst_40 = arith.constant 0.000000e+00 : f32
      %61 = vector.broadcast %cst_40 : f32 to vector<2x1x128xf32>
      %c0_41 = arith.constant 0 : index
      %c0_42 = arith.constant 0 : index
      %c0_43 = arith.constant 0 : index
      %62 = vector.load %arg9[%c0_41, %c0_42, %c0_43] : memref<2x1x128xf32, #tpu.memory_space<vmem>>, vector<2x1x128xf32>
      tpu.vector_store %arg9[%c0_41, %c0_42, %c0_43], %61 {strides = array<i32>} : memref<2x1x128xf32, #tpu.memory_space<vmem>>, vector<2x1x128xf32>,
    } else {
    }
    %c0 = arith.constant 0 : index
    %c0_1 = arith.constant 0 : index
    %c0_2 = arith.constant 0 : index
    %3 = vector.load %arg2[%c0, %c0_1, %c0_2] : memref<2x4x256xf32, #tpu.memory_space<vmem>>, vector<2x4x256xf32>
    %c0_3 = arith.constant 0 : index
    %c0_4 = arith.constant 0 : index
    %4 = vector.load %arg3[%c0_3, %c0_4] : memref<2x256xi8, #tpu.memory_space<vmem>>, vector<2x256xi8>
    %5 = arith.extsi %4 : vector<2x256xi8> to vector<2x256xi32>
    %6 = tpu.iota {dimensions = array<i32: 1>} : vector<2x4x256xi32>
    %7 = vector.shape_cast %5 : vector<2x256xi32> to vector<2x1x256xi32>
    %8 = vector.broadcast %7 : vector<2x1x256xi32> to vector<2x4x256xi32>
    %9 = arith.cmpi eq, %6, %8 : vector<2x4x256xi32>
    %cst = arith.constant dense<0xFF800000> : vector<2x256xf32>
    %10 = vector.multi_reduction <maximumf>, %3, %cst [1] : vector<2x4x256xf32> to vector<2x256xf32>
    %11 = vector.shape_cast %10 : vector<2x256xf32> to vector<2x1x256xf32>
    %12 = vector.broadcast %11 : vector<2x1x256xf32> to vector<2x4x256xf32>
    %13 = arith.subf %3, %12 : vector<2x4x256xf32>
    %14 = math.exp %13 : vector<2x4x256xf32>
    %cst_5 = arith.constant dense<0.000000e+00> : vector<2x256xf32>
    %15 = vector.multi_reduction <add>, %14, %cst_5 [1] : vector<2x4x256xf32> to vector<2x256xf32>
    %16 = vector.shape_cast %15 : vector<2x256xf32> to vector<2x1x256xf32>
    %17 = tpu.reciprocal %16 {approx = true} : vector<2x1x256xf32> -> vector<2x1x256xf32>
    %18 = arith.mulf %16, %17 : vector<2x1x256xf32>
    %cst_6 = arith.constant 2.000000e+00 : f32
    %19 = vector.broadcast %cst_6 : f32 to vector<2x1x256xf32>
    %20 = arith.subf %19, %18 : vector<2x1x256xf32>
    %21 = arith.mulf %17, %20 : vector<2x1x256xf32>
    %22 = vector.broadcast %21 : vector<2x1x256xf32> to vector<2x4x256xf32>
    %23 = arith.mulf %14, %22 : vector<2x4x256xf32>
    %cst_7 = arith.constant 0.000000e+00 : f32
    %24 = vector.broadcast %cst_7 : f32 to vector<2x4x256xf32>
    %25 = arith.select %9, %13, %24 : vector<2x4x256xi1>, vector<2x4x256xf32>
    %cst_8 = arith.constant dense<0.000000e+00> : vector<2x256xf32>
    %26 = vector.multi_reduction <add>, %25, %cst_8 [1] : vector<2x4x256xf32> to vector<2x256xf32>
    %27 = vector.shape_cast %26 : vector<2x256xf32> to vector<2x1x256xf32>
    %28 = math.log %16 : vector<2x1x256xf32>
    %29 = arith.subf %28, %27 : vector<2x1x256xf32>
    %cst_9 = arith.constant 1.000000e+00 : f32
    %cst_10 = arith.constant 0.000000e+00 : f32
    %30 = vector.broadcast %cst_9 : f32 to vector<2x4x256xf32>
    %31 = vector.broadcast %cst_10 : f32 to vector<2x4x256xf32>
    %32 = arith.select %9, %30, %31 : vector<2x4x256xi1>, vector<2x4x256xf32>
    %cst_11 = arith.constant 0.000000e+00 : f32
    %33 = vector.broadcast %cst_11 : f32 to vector<2x4x256xf32>
    %34 = arith.select %9, %23, %33 : vector<2x4x256xi1>, vector<2x4x256xf32>
    %35 = arith.addf %23, %32 : vector<2x4x256xf32>
    %c0_12 = arith.constant 0 : index
    %c0_13 = arith.constant 0 : index
    %c0_14 = arith.constant 0 : index
    %36 = vector.load %arg7[%c0_12, %c0_13, %c0_14] : memref<2x4x128xf32, #tpu.memory_space<vmem>>, vector<2x4x128xf32>
    %37 = vector.extract_strided_slice %34 {offsets = [0, 0, 0], sizes = [2, 4, 128], strides = [1, 1, 1]} : vector<2x4x256xf32> to vector<2x4x128xf32>
    %38 = vector.extract_strided_slice %34 {offsets = [0, 0, 128], sizes = [2, 4, 128], strides = [1, 1, 1]} : vector<2x4x256xf32> to vector<2x4x128xf32>
    %39 = arith.addf %37, %38 : vector<2x4x128xf32>
    %40 = arith.addf %36, %39 : vector<2x4x128xf32>
    %c0_15 = arith.constant 0 : index
    %c0_16 = arith.constant 0 : index
    %c0_17 = arith.constant 0 : index
    %41 = vector.load %arg7[%c0_15, %c0_16, %c0_17] : memref<2x4x128xf32, #tpu.memory_space<vmem>>, vector<2x4x128xf32>
    tpu.vector_store %arg7[%c0_15, %c0_16, %c0_17], %40 {strides = array<i32>} : memref<2x4x128xf32, #tpu.memory_space<vmem>>, vector<2x4x128xf32>,
    %c0_18 = arith.constant 0 : index
    %c0_19 = arith.constant 0 : index
    %c0_20 = arith.constant 0 : index
    %42 = vector.load %arg8[%c0_18, %c0_19, %c0_20] : memref<2x4x128xf32, #tpu.memory_space<vmem>>, vector<2x4x128xf32>
    %43 = vector.extract_strided_slice %35 {offsets = [0, 0, 0], sizes = [2, 4, 128], strides = [1, 1, 1]} : vector<2x4x256xf32> to vector<2x4x128xf32>
    %44 = vector.extract_strided_slice %35 {offsets = [0, 0, 128], sizes = [2, 4, 128], strides = [1, 1, 1]} : vector<2x4x256xf32> to vector<2x4x128xf32>
    %45 = arith.addf %43, %44 : vector<2x4x128xf32>
    %46 = arith.addf %42, %45 : vector<2x4x128xf32>
    %c0_21 = arith.constant 0 : index
    %c0_22 = arith.constant 0 : index
    %c0_23 = arith.constant 0 : index
    %47 = vector.load %arg8[%c0_21, %c0_22, %c0_23] : memref<2x4x128xf32, #tpu.memory_space<vmem>>, vector<2x4x128xf32>
    tpu.vector_store %arg8[%c0_21, %c0_22, %c0_23], %46 {strides = array<i32>} : memref<2x4x128xf32, #tpu.memory_space<vmem>>, vector<2x4x128xf32>,
    %c0_24 = arith.constant 0 : index
    %c0_25 = arith.constant 0 : index
    %c0_26 = arith.constant 0 : index
    %48 = vector.load %arg9[%c0_24, %c0_25, %c0_26] : memref<2x1x128xf32, #tpu.memory_space<vmem>>, vector<2x1x128xf32>
    %49 = vector.extract_strided_slice %29 {offsets = [0, 0, 0], sizes = [2, 1, 128], strides = [1, 1, 1]} : vector<2x1x256xf32> to vector<2x1x128xf32>
    %50 = vector.extract_strided_slice %29 {offsets = [0, 0, 128], sizes = [2, 1, 128], strides = [1, 1, 1]} : vector<2x1x256xf32> to vector<2x1x128xf32>
    %51 = arith.addf %49, %50 : vector<2x1x128xf32>
    %52 = arith.addf %48, %51 : vector<2x1x128xf32>
    %c0_27 = arith.constant 0 : index
    %c0_28 = arith.constant 0 : index
    %c0_29 = arith.constant 0 : index
    %53 = vector.load %arg9[%c0_27, %c0_28, %c0_29] : memref<2x1x128xf32, #tpu.memory_space<vmem>>, vector<2x1x128xf32>
    tpu.vector_store %arg9[%c0_27, %c0_28, %c0_29], %52 {strides = array<i32>} : memref<2x1x128xf32, #tpu.memory_space<vmem>>, vector<2x1x128xf32>,
    %c0_i32_30 = arith.constant 0 : i32
    %54 = arith.cmpi eq, %arg1, %c0_i32_30 : i32
    %55 = arith.extui %54 : i1 to i32
    %c0_i32_31 = arith.constant 0 : i32
    %56 = arith.cmpi ne, %55, %c0_i32_31 : i32
    scf.if %56 {
      %c0_32 = arith.constant 0 : index
      %c0_33 = arith.constant 0 : index
      %c0_34 = arith.constant 0 : index
      %57 = vector.load %arg7[%c0_32, %c0_33, %c0_34] : memref<2x4x128xf32, #tpu.memory_space<vmem>>, vector<2x4x128xf32>
      %cst_35 = arith.constant dense<0.000000e+00> : vector<2x4xf32>
      %58 = vector.multi_reduction <add>, %57, %cst_35 [2] : vector<2x4x128xf32> to vector<2x4xf32>
      %c0_36 = arith.constant 0 : index
      %c0_37 = arith.constant 0 : index
      %c0_38 = arith.constant 0 : index
      %59 = vector.load %arg4[%c0_36, %c0_37, %c0_38] : memref<1x2x4xf32, #tpu.memory_space<vmem>>, vector<1x2x4xf32>
      %60 = vector.shape_cast %59 : vector<1x2x4xf32> to vector<2x4xf32>
      %61 = vector.shape_cast %58 : vector<2x4xf32> to vector<1x2x4xf32>
      tpu.vector_store %arg4[%c0_36, %c0_37, %c0_38], %61 {strides = array<i32>} : memref<1x2x4xf32, #tpu.memory_space<vmem>>, vector<1x2x4xf32>,
      %c0_39 = arith.constant 0 : index
      %c0_40 = arith.constant 0 : index
      %c0_41 = arith.constant 0 : index
      %62 = vector.load %arg8[%c0_39, %c0_40, %c0_41] : memref<2x4x128xf32, #tpu.memory_space<vmem>>, vector<2x4x128xf32>
      %cst_42 = arith.constant dense<0.000000e+00> : vector<2x4xf32>
      %63 = vector.multi_reduction <add>, %62, %cst_42 [2] : vector<2x4x128xf32> to vector<2x4xf32>
      %c0_43 = arith.constant 0 : index
      %c0_44 = arith.constant 0 : index
      %c0_45 = arith.constant 0 : index
      %64 = vector.load %arg5[%c0_43, %c0_44, %c0_45] : memref<1x2x4xf32, #tpu.memory_space<vmem>>, vector<1x2x4xf32>
      %65 = vector.shape_cast %64 : vector<1x2x4xf32> to vector<2x4xf32>
      %66 = vector.shape_cast %63 : vector<2x4xf32> to vector<1x2x4xf32>
      tpu.vector_store %arg5[%c0_43, %c0_44, %c0_45], %66 {strides = array<i32>} : memref<1x2x4xf32, #tpu.memory_space<vmem>>, vector<1x2x4xf32>,
      %c0_46 = arith.constant 0 : index
      %c0_47 = arith.constant 0 : index
      %c0_48 = arith.constant 0 : index
      %67 = vector.load %arg9[%c0_46, %c0_47, %c0_48] : memref<2x1x128xf32, #tpu.memory_space<vmem>>, vector<2x1x128xf32>
      %cst_49 = arith.constant dense<0.000000e+00> : vector<2x1xf32>
      %68 = vector.multi_reduction <add>, %67, %cst_49 [2] : vector<2x1x128xf32> to vector<2x1xf32>
      %c0_50 = arith.constant 0 : index
      %c0_51 = arith.constant 0 : index
      %c0_52 = arith.constant 0 : index
      %69 = vector.load %arg6[%c0_50, %c0_51, %c0_52] : memref<1x2x1xf32, #tpu.memory_space<vmem>>, vector<1x2x1xf32>
      %70 = vector.shape_cast %69 : vector<1x2x1xf32> to vector<2x1xf32>
      %71 = vector.shape_cast %68 : vector<2x1xf32> to vector<1x2x1xf32>
      tpu.vector_store %arg6[%c0_50, %c0_51, %c0_52], %71 {strides = array<i32>} : memref<1x2x1xf32, #tpu.memory_space<vmem>>, vector<1x2x1xf32>,
    } else {
    }
    return
  }
  func.func @transform_0(%arg0: i32, %arg1: i32) -> (i32, i32, i32) {
    %c1_i32 = arith.constant 1 : i32
    %0 = arith.muli %arg0, %c1_i32 : i32
    %1 = arith.addi %0, %arg1 : i32
    %c0_i32 = arith.constant 0 : i32
    %c0_i32_0 = arith.constant 0 : i32
    %c0_i32_1 = arith.constant 0 : i32
    return %c0_i32, %c0_i32_0, %1 : i32, i32, i32
  }
  func.func @transform_1(%arg0: i32, %arg1: i32) -> (i32, i32) {
    %c1_i32 = arith.constant 1 : i32
    %0 = arith.muli %arg0, %c1_i32 : i32
    %1 = arith.addi %0, %arg1 : i32
    %c0_i32 = arith.constant 0 : i32
    %c0_i32_0 = arith.constant 0 : i32
    return %c0_i32, %1 : i32, i32
  }
  func.func @transform_2(%arg0: i32, %arg1: i32) -> (i32, i32, i32) {
    %c0_i32 = arith.constant 0 : i32
    %c0_i32_0 = arith.constant 0 : i32
    %c0_i32_1 = arith.constant 0 : i32
    return %arg0, %c0_i32, %c0_i32_0 : i32, i32, i32
  }
  func.func @transform_3(%arg0: i32, %arg1: i32) -> (i32, i32, i32) {
    %c0_i32 = arith.constant 0 : i32
    %c0_i32_0 = arith.constant 0 : i32
    %c0_i32_1 = arith.constant 0 : i32
    return %arg0, %c0_i32, %c0_i32_0 : i32, i32, i32
  }
  func.func @transform_4(%arg0: i32, %arg1: i32) -> (i32, i32, i32) {
    %c0_i32 = arith.constant 0 : i32
    %c0_i32_0 = arith.constant 0 : i32
    %c0_i32_1 = arith.constant 0 : i32
    return %arg0, %c0_i32, %c0_i32_0 : i32, i32, i32
  }
}

</mosaic_0001>

<bundles_post_ra>
// kernel: tpu_custom_call.1
= control target key start
LH: loop header
LB: loop body
LE: loop exit
PB: predicated region body
PF: predicated region fallthrough
CT: control target
= control target key end

     0   :  { %10 = vsyncpa [#allocation6], 0  ;;  %s698_s0 = inlined_call_operand.hbm [shape: f32[2,4,256], index: 0, kind: input, shape index: {}]   ;;  %s699_s1 = inlined_call_operand.hbm [shape: s8[2,256], index: 1, kind: input, shape index: {}]   ;;  %s700_s2 = inlined_call_operand.hbm [shape: f32[1,2,4], index: 2, kind: output, shape index: {0}]   ;;  %s701_s3 = inlined_call_operand.hbm [shape: f32[1,2,4], index: 3, kind: output, shape index: {1}]   ;;  %s702_s4 = inlined_call_operand.vmem [shape: f32[1,2,1], index: 4, kind: output, shape index: {2}]  }
   0x1   :  { %11 = vsyncpa [#allocation9], 0 }
   0x2   :  { %12 = vsyncpa [#allocation7], 0 }
   0x3   :  { %13 = vsyncpa [#allocation12], 0  ;;  %s542_s15 = smov [#allocation5]  }
   0x4   :  { %s23_s16 = sshll.u32 %s542_s15, 4  ;;  %s24_s16 = int_to_ptr.vmem [resolvable:$true] %s23_s16 }
   0x5   :  { %s462_s17 = scalar_lea.vmem %s24_s16, 256  ;;  %p467_p1 = scmp.lt.s32.totalorder %s24_s16, %s24_s16 }
   0x6   :  { %p463_p0 = scmp.ne.s32.totalorder %s24_s16, %s462_s17  ;;  %p468_p2 = scmp.lt.s32.totalorder %s462_s17, %s462_s17 }
   0x8   :  { %p469_p3 = por %p468_p2, %p467_p1 }
   0xa   :  { %p470_p4 = pnand %p469_p3, %p463_p0 }
   0xc   :  { %473 = shalt.err (!%p470_p4)
}
   0xd   :  { %s543_s18 = smov 128   ;;  %s544_s19 = smov 8  }
   0xe   :  { %29 = dma.hbm_to_vmem [thread:$0]  %s698_s0, 256, %s24_s16, [#allocation6], %s543_s18, %s543_s18, %s544_s19  }
   0xf   :  { %s545_s22 = smov [#allocation8]  }
  0x10   :  { %s40_s23 = sshll.u32 %s545_s22, 4  ;;  %s41_s23 = int_to_ptr.vmem [resolvable:$true] %s40_s23 }
  0x11   :  { %s482_s24 = scalar_lea.vmem %s41_s23, 32  ;;  %p487_p6 = scmp.lt.s32.totalorder %s41_s23, %s41_s23 }
  0x12   :  { %p483_p5 = scmp.ne.s32.totalorder %s41_s23, %s482_s24  ;;  %p488_p7 = scmp.lt.s32.totalorder %s482_s24, %s482_s24 }
  0x14   :  { %p489_p8 = por %p488_p7, %p487_p6 }
  0x16   :  { %p490_p9 = pnand %p489_p8, %p483_p5 }
  0x18   :  { %493 = shalt.err (!%p490_p9)
}
  0x19   :  { %43 = dma.hbm_to_vmem [thread:$0]  %s699_s1, 32, %s41_s23, [#allocation9]  }
  0x1a   :  { %534 = dma.done.wait [#allocation6], 256  }
  0x1b   :  { %535 = vsyncadd [#allocation6], 4294967040 }
  0x1c   :  { %536 = dma.done.wait [#allocation9], 32  }
  0x1d   :  { %537 = vsyncadd [#allocation9], 4294967264  ;;  %v68_v0 = vlaneseq  ;;  %v546_v1 = vmov 0.0   ;;  %vm118_vm0 = vcmask 1043456   ;;  %v64_v5 = vld [vmem:[#allocation5] sm:$0xff]  ;;  %v65_v6 = vld [vmem:[#allocation5 + $0x8] sm:$0xff] }
  0x1e   :  { %58 = vst [vmem:[#allocation2] sm:$0xf] %v546_v1  ;;  %59 = vst [vmem:[#allocation2 + $0x4] sm:$0xf] %v546_v1  ;;  %v114_v7 = vcombine.high %v64_v5, %v64_v5  ;;  %v119_v8 = vsel %vm118_vm0, %v64_v5, -inf  ;;  %v115_v9 = vcombine.high %v65_v6, %v65_v6  ;;  %v133_v11 = vsel %vm118_vm0, %v65_v6, -inf }
  0x1f   :  { %60 = vst [vmem:[#allocation3] sm:$0xf] %v546_v1  ;;  %61 = vst [vmem:[#allocation3 + $0x4] sm:$0xf] %v546_v1  ;;  %v587_v2 = vshrl.u32 %v68_v0, 7  ;;  %v339_v3 = vand.u32 127, %v68_v0 }
  0x20   :  { %62 = vst [vmem:[#allocation4] sm:$0x1] %v546_v1  ;;  %63 = vst [vmem:[#allocation4 + $0x1] sm:$0x1] %v546_v1  ;;  %v120_v10 = vrot.slane %v119_v8, 4  ;;  %v126_v12 = vsel %vm118_vm0, %v114_v7, -inf }
  0x21   :  { %v590_v4 = vsub.s32 %v339_v3, %v587_v2  ;;  %v134_v13 = vrot.slane %v133_v11, 4  ;;  %v140_v14 = vsel %vm118_vm0, %v115_v9, -inf  ;;  %v127_v16 = vrot.slane %v126_v12, 4  ;;  %v66_v32 = vld [vmem:[#allocation8] sm:$0x3]  ;;  %s548_s0 = smov [#allocation10]  }
  0x22   :  { %v121_v15 = vmax.f32 %v119_v8, %v120_v10  ;;  %v141_v17 = vrot.slane %v140_v14, 4  ;;  %v547_v22 = vmov 1966171168   ;;  %v67_v39 = vunpack.c.0.s8 %v66_v32  ;;  %s396_s1 = sshll.u32 %s548_s0, 4  ;;  %s549_s27 = smov [#allocation11]   ;;  %s397_s1 = int_to_ptr.vmem [resolvable:$true] %s396_s1 }
  0x23   :  { %v135_v18 = vmax.f32 %v133_v11, %v134_v13  ;;  %v128_v20 = vmax.f32 %v126_v12, %v127_v16  ;;  %v71_v23 = vunpack.c.l.s4 %v547_v22  ;;  %v94_v52 = vsub.s32 0, %v587_v2  ;;  %s406_s28 = sshll.u32 %s549_s27, 4  ;;  %s494_s29 = scalar_lea.vmem %s397_s1, 32  ;;  %s407_s28 = int_to_ptr.vmem [resolvable:$true] %s406_s28 }
  0x24   :  { %v122_v19 = vrot.slane %v121_v15, 2  ;;  %v142_v21 = vmax.f32 %v140_v14, %v141_v17  ;;  %v98_v54 = vsub.s32 1, %v587_v2  ;;  %vm376_vm5 = vcmask 1040384   ;;  %p495_p10 = scmp.ne.s32.totalorder %s397_s1, %s494_s29  ;;  %p499_p11 = scmp.lt.s32.totalorder %s397_s1, %s397_s1 }
  0x25   :  { %v136_v24 = vrot.slane %v135_v18, 2  ;;  %v129_v26 = vrot.slane %v128_v20, 2  ;;  %v72_v30 = vunpack.c.0.s8 %v71_v23  ;;  %vm348_vm6 = vcmask 1041409   ;;  %p500_p12 = scmp.lt.s32.totalorder %s494_s29, %s494_s29 }
  0x26   :  { %v123_v25 = vmax.f32 %v121_v15, %v122_v19  ;;  %v143_v27 = vrot.slane %v142_v21, 2  ;;  %vm351_vm7 = vcmask 25600   ;;  %vm388_vm8 = vcmask 1024  }
  0x27   :  { %v130_v29 = vmax.f32 %v128_v20, %v129_v26  ;;  %v137_v31 = vmax.f32 %v135_v18, %v136_v24  ;;  %v75_v40 = vsub.s32 %v72_v30, %v587_v2  ;;  %p501_p13 = por %p500_p12, %p499_p11 }
  0x28   :  { %v124_v28 = vrot.slane %v123_v25, 1  ;;  %v144_v35 = vmax.f32 %v142_v21, %v143_v27 }
  0x29   :  { %v131_v34 = vrot.slane %v130_v29, 1  ;;  %v138_v36 = vrot.slane %v137_v31, 1  ;;  %v76_v46 = vrot.slane %v67_v39, %v75_v40  ;;  %p502_p0 = pnand %p501_p13, %p495_p10 }
  0x2a   :  { %v125_v33 = vmax.f32 %v123_v25, %v124_v28  ;;  %v145_v38 = vrot.slane %v144_v35, 1 }
  0x2b   :  { %v132_v37 = vmax.f32 %v130_v29, %v131_v34  ;;  %v139_v41 = vmax.f32 %v137_v31, %v138_v36  ;;  %v77_v50 = vcombine.high %v76_v46, %v76_v46  ;;  %v84_v51 = vrot.slane %v76_v46, %v75_v40 }
  0x2c   :  { %v146_v43 = vmax.f32 %v144_v35, %v145_v38 }
  0x2d   :  { %v151_v42 = vcombine.low %v125_v33, %v132_v37  ;;  %v91_v53 = vrot.slane %v77_v50, %v75_v40  ;;  %v599_v55 = vrot.slane %v84_v51, %v94_v52  ;;  %v605_v58 = vrot.slane %v84_v51, %v98_v54 }
  0x2e   :  { %v152_v45 = vcombine.low %v139_v41, %v146_v43 }
  0x2f   :  { %v155_v44 = vsub.f32 %v64_v5, %v151_v42  ;;  %v601_v56 = vrot.slane %v91_v53, %v94_v52  ;;  %v603_v57 = vrot.slane %v91_v53, %v98_v54  ;;  %vm108_vm1 = vcmp.eq.s32.totalorder %v587_v2, %v599_v55 }
  0x30   :  { %v156_v48 = vsub.f32 %v65_v6, %v152_v45  ;;  %vm109_vm4 = vcmp.eq.s32.totalorder %v587_v2, %v605_v58 }
  0x31   :  { %v157_v47 = vmul.f32 1.442695, %v155_v44  ;;  %vm110_vm2 = vcmp.eq.s32.totalorder %v587_v2, %v601_v56  ;;  %v223_v63 = vcombine.high %v155_v44, %v155_v44  ;;  %vm111_vm3 = vcmp.eq.s32.totalorder %v587_v2, %v603_v57 }
  0x32   :  { %v159_v49 = vmul.f32 1.442695, %v156_v48  ;;  %v224_v60 = vcombine.high %v156_v48, %v156_v48  ;;  %v227_v5 = vsel %vm108_vm1, %v155_v44, 0.0  ;;  %v229_v9 = vsel %vm110_vm2, %v156_v48, 0.0 }
  0x33   :  { %434 = vpow2.f32 %v157_v47  ;;  %v228_v14 = vsel %vm109_vm4, %v223_v63, 0.0  ;;  %v231_v20 = vsel %vm118_vm0, %v227_v5, 0.0  ;;  %v245_v21 = vsel %vm118_vm0, %v229_v9, 0.0 }
  0x34   :  { %436 = vpow2.f32 %v159_v49  ;;  %v230_v13 = vsel %vm111_vm3, %v224_v60, 0.0  ;;  %v238_v27 = vsel %vm118_vm0, %v228_v14, 0.0  ;;  %v232_v32 = vrot.slane %v231_v20, 4 }
  0x35   :  { %v252_v22 = vsel %vm118_vm0, %v230_v13, 0.0  ;;  %v246_v33 = vrot.slane %v245_v21, 4  ;;  %v239_v39 = vrot.slane %v238_v27, 4  ;;  %v272_v13 = vsel %vm109_vm4, 1.0, %v546_v1 }
  0x36   :  { %v253_v34 = vrot.slane %v252_v22, 4  ;;  %v233_v43 = vadd.f32 %v232_v32, %v231_v20  ;;  %v273_v32 = vsel %vm110_vm2, 1.0, %v546_v1 }
  0x37   :  { %v247_v44 = vadd.f32 %v246_v33, %v245_v21  ;;  %v240_v47 = vadd.f32 %v239_v39, %v238_v27 }
  0x38   :  { %v254_v46 = vadd.f32 %v253_v34, %v252_v22  ;;  %v234_v49 = vrot.slane %v233_v43, 2 }
  0x39   :  { %v248_v48 = vrot.slane %v247_v44, 2  ;;  %v241_v51 = vrot.slane %v240_v47, 2 }
  0x3a   :  { %v255_v50 = vrot.slane %v254_v46, 2  ;;  %v235_v53 = vadd.f32 %v234_v49, %v233_v43 }
  0x3b   :  { %v249_v52 = vadd.f32 %v248_v48, %v247_v44  ;;  %v242_v60 = vadd.f32 %v241_v51, %v240_v47  ;;  %v317_v47 = vld [vmem:[#allocation4] sm:$0x1] }
  0x3c   :  { %v256_v54 = vadd.f32 %v255_v50, %v254_v46  ;;  %v236_v63 = vrot.slane %v235_v53, 1 }
  0x40   :  { %v609_v59 = vpop.eup %434 }
  0x41   :  { %v163_v61 = vcombine.high %v609_v59, %v609_v59  ;;  %v167_v62 = vsel %vm118_vm0, %v609_v59, 0.0  ;;  %v619_v0 = vpop.eup %436 }
  0x42   :  { %v168_v3 = vrot.slane %v167_v62, 4  ;;  %v164_v7 = vcombine.high %v619_v0, %v619_v0  ;;  %v181_v8 = vsel %vm118_vm0, %v619_v0, 0.0 }
  0x43   :  { %v174_v6 = vsel %vm118_vm0, %v163_v61, 0.0  ;;  %v182_v12 = vrot.slane %v181_v8, 4 }
  0x44   :  { %v169_v10 = vadd.f32 %v168_v3, %v167_v62  ;;  %v175_v11 = vrot.slane %v174_v6, 4  ;;  %v188_v15 = vsel %vm118_vm0, %v164_v7, 0.0  ;;  %v250_v62 = vrot.slane %v249_v52, 1 }
  0x45   :  { %v183_v18 = vadd.f32 %v182_v12, %v181_v8  ;;  %v189_v19 = vrot.slane %v188_v15, 4  ;;  %v243_v8 = vrot.slane %v242_v60, 1  ;;  %v271_v12 = vsel %vm108_vm1, 1.0, %v546_v1 }
  0x46   :  { %v170_v16 = vrot.slane %v169_v10, 2  ;;  %v176_v17 = vadd.f32 %v175_v11, %v174_v6  ;;  %v257_v6 = vrot.slane %v256_v54, 1 }
  0x47   :  { %v184_v25 = vrot.slane %v183_v18, 2  ;;  %v190_v26 = vadd.f32 %v189_v19, %v188_v15 }
  0x48   :  { %v171_v23 = vadd.f32 %v170_v16, %v169_v10  ;;  %v177_v24 = vrot.slane %v176_v17, 2  ;;  %v251_v16 = vadd.f32 %v250_v62, %v249_v52 }
  0x49   :  { %v185_v30 = vadd.f32 %v184_v25, %v183_v18  ;;  %v191_v31 = vrot.slane %v190_v26, 2  ;;  %v289_v25 = vcombine.low %v271_v12, %v272_v13 }
  0x4a   :  { %v172_v28 = vrot.slane %v171_v23, 1  ;;  %v178_v29 = vadd.f32 %v177_v24, %v176_v17  ;;  %v237_v17 = vadd.f32 %v236_v63, %v235_v53 }
  0x4b   :  { %v186_v37 = vrot.slane %v185_v30, 1  ;;  %v192_v38 = vadd.f32 %v191_v31, %v190_v26 }
  0x4c   :  { %v173_v35 = vadd.f32 %v172_v28, %v171_v23  ;;  %v179_v36 = vrot.slane %v178_v29, 1  ;;  %v258_v23 = vadd.f32 %v257_v6, %v256_v54  ;;  %v244_v28 = vadd.f32 %v243_v8, %v242_v60  ;;  %v295_v60 = vld [vmem:[#allocation2] sm:$0xf] }
  0x4d   :  { %v187_v41 = vadd.f32 %v186_v37, %v185_v30  ;;  %v193_v42 = vrot.slane %v192_v38, 1 }
  0x4e   :  { %v180_v40 = vadd.f32 %v179_v36, %v178_v29  ;;  %438 = vrcp.f32 %v173_v35 }
  0x4f   :  { %440 = vlog2.f32 %v173_v35  ;;  %v194_v45 = vadd.f32 %v193_v42, %v192_v38 }
  0x50   :  { %442 = vrcp.f32 %v180_v40 }
  0x51   :  { %444 = vrcp.f32 %v187_v41 }
  0x52   :  { %446 = vrcp.f32 %v194_v45 }
  0x53   :  { %448 = vlog2.f32 %v187_v41 }
  0x54   :  { %450 = vlog2.f32 %v194_v45 }
  0x55   :  { %452 = vlog2.f32 %v180_v40 }
  0x5b   :  { %v439_v61 = vpop.eup %438 }
  0x5c   :  { %v441_v3 = vpop.eup %440  ;;  %v199_v5 = vmul.f32 %v439_v61, %v173_v35 }
  0x5d   :  { %v443_v7 = vpop.eup %442  ;;  %v260_v18 = vmul.f32 0.6931472, %v441_v3 }
  0x5e   :  { %v445_v9 = vpop.eup %444  ;;  %v200_v10 = vmul.f32 %v443_v7, %v180_v40  ;;  %v203_v11 = vsub.f32 2.0, %v199_v5  ;;  %v274_v40 = vsel %vm111_vm3, 1.0, %v546_v1  ;;  %v303_v5 = vld [vmem:[#allocation3] sm:$0xf] }
  0x5f   :  { %v447_v14 = vpop.eup %446  ;;  %v201_v15 = vmul.f32 %v445_v9, %v187_v41  ;;  %v267_v37 = vsub.f32 %v260_v18, %v237_v17  ;;  %v290_v48 = vcombine.low %v273_v32, %v274_v40 }
  0x60   :  { %v449_v19 = vpop.eup %448  ;;  %v204_v20 = vsub.f32 2.0, %v200_v10  ;;  %v207_v21 = vmul.f32 %v439_v61, %v203_v11  ;;  %v202_v22 = vmul.f32 %v447_v14, %v194_v45  ;;  %v318_v45 = vld [vmem:[#allocation4 + $0x1] sm:$0x1]  ;;  %v304_v11 = vld [vmem:[#allocation3 + $0x4] sm:$0xf] }
  0x61   :  { %v451_v24 = vpop.eup %450  ;;  %v205_v26 = vsub.f32 2.0, %v201_v15  ;;  %v264_v27 = vmul.f32 0.6931472, %v449_v19 }
  0x62   :  { %v453_v29 = vpop.eup %452  ;;  %v208_v30 = vmul.f32 %v443_v7, %v204_v20  ;;  %v206_v31 = vsub.f32 2.0, %v202_v22  ;;  %v266_v33 = vmul.f32 0.6931472, %v451_v24  ;;  %v296_v7 = vld [vmem:[#allocation2 + $0x4] sm:$0xf] }
  0x63   :  { %v209_v34 = vmul.f32 %v445_v9, %v205_v26  ;;  %v269_v35 = vsub.f32 %v264_v27, %v251_v16  ;;  %v262_v36 = vmul.f32 0.6931472, %v453_v29 }
  0x64   :  { %v215_v38 = vcombine.low %v207_v21, %v208_v30  ;;  %v210_v39 = vmul.f32 %v447_v14, %v206_v31  ;;  %v270_v41 = vsub.f32 %v266_v33, %v258_v23 }
  0x65   :  { %v268_v42 = vsub.f32 %v262_v36, %v244_v28 }
  0x66   :  { %v219_v43 = vmul.f32 %v609_v59, %v215_v38  ;;  %v216_v44 = vcombine.low %v209_v34, %v210_v39  ;;  %v320_v46 = vadd.f32 %v270_v41, %v269_v35 }
  0x67   :  { %v319_v49 = vadd.f32 %v268_v42, %v267_v37 }
  0x68   :  { %v277_v50 = vcombine.high %v219_v43, %v219_v43  ;;  %v281_v51 = vsel %vm108_vm1, %v219_v43, 0.0  ;;  %v293_v52 = vadd.f32 %v289_v25, %v219_v43  ;;  %v220_v53 = vmul.f32 %v619_v0, %v216_v44 }
  0x69   :  { %v322_v54 = vadd.f32 %v320_v46, %v318_v45  ;;  %v321_v1 = vadd.f32 %v319_v49, %v317_v47 }
  0x6a   :  { %v282_v59 = vsel %vm109_vm4, %v277_v50, 0.0  ;;  %v307_v61 = vrot.slane %v293_v52, 4  ;;  %v278_v62 = vcombine.high %v220_v53, %v220_v53  ;;  %v283_v63 = vsel %vm110_vm2, %v220_v53, 0.0 }
  0x6b   :  { %v297_v3 = vadd.f32 %v282_v59, %v281_v51  ;;  %v294_v55 = vadd.f32 %v290_v48, %v220_v53  ;;  %324 = vst [vmem:[#allocation4 + $0x1] sm:$0x1] %v322_v54  ;;  %323 = vst [vmem:[#allocation4] sm:$0x1] %v321_v1 }
  0x6c   :  { %v311_v6 = vadd.f32 %v307_v61, %v293_v52  ;;  %v284_v0 = vsel %vm111_vm3, %v278_v62, 0.0 }
  0x6d   :  { %v299_v58 = vadd.f32 %v297_v3, %v295_v60  ;;  %v298_v8 = vadd.f32 %v284_v0, %v283_v63  ;;  %v308_v9 = vrot.slane %v294_v55, 4 }
  0x6e   :  { %v313_v10 = vadd.f32 %v311_v6, %v303_v5 }
  0x6f   :  { %301 = vst [vmem:[#allocation2] sm:$0xf] %v299_v58  ;;  %v300_v12 = vadd.f32 %v298_v8, %v296_v7  ;;  %v312_v56 = vadd.f32 %v308_v9, %v294_v55 }
  0x70   :  { %315 = vst [vmem:[#allocation3] sm:$0xf] %v313_v10 }
  0x71   :  { %302 = vst [vmem:[#allocation2 + $0x4] sm:$0xf] %v300_v12  ;;  %v314_v13 = vadd.f32 %v312_v56, %v304_v11 }
  0x72   :  { %v375_v19 = vld [vmem:[#allocation4 + $0x1] sm:$0x1]  ;;  %v374_v21 = vld [vmem:[#allocation4] sm:$0x1] }
  0x73   :  { %316 = vst [vmem:[#allocation3 + $0x4] sm:$0xf] %v314_v13  ;;  %v380_v22 = vsel %vm376_vm5, %v375_v19, 0.0  ;;  %v377_v23 = vsel %vm376_vm5, %v374_v21, 0.0 }
  0x76   :  { %v328_v14 = vld [vmem:[#allocation2] sm:$0xf] }
  0x77   :  { %v330_v15 = vsel %vm118_vm0, %v328_v14, 0.0  ;;  %v353_v16 = vld [vmem:[#allocation3] sm:$0xf] }
  0x78   :  { %331 = vadd.xlane.f32.xlu0 %v330_v15  ;;  %v355_v2 = vsel %vm118_vm0, %v353_v16, 0.0  ;;  %v329_v57 = vld [vmem:[#allocation2 + $0x4] sm:$0xf] }
  0x79   :  { %356 = vadd.xlane.f32.xlu1 %v355_v2  ;;  %v333_v17 = vsel %vm118_vm0, %v329_v57, 0.0 }
  0x7a   :  { %v354_v18 = vld [vmem:[#allocation3 + $0x4] sm:$0xf] }
  0x7b   :  { %v358_v20 = vsel %vm118_vm0, %v354_v18, 0.0 }
  0x7c   :  { %334 = vadd.xlane.f32.xlu0 %v333_v17 }
  0x7d   :  { %359 = vadd.xlane.f32.xlu1 %v358_v20 }
  0x80   :  { %381 = vadd.xlane.f32.xlu0 %v380_v22 }
  0x81   :  { %378 = vadd.xlane.f32.xlu1 %v377_v23 }
 0x101   :  { %v332_v24 = vpop.xlane.xlu0 %331 }
 0x102   :  { %v357_v25 = vpop.xlane.xlu1 %356  ;;  %v343_v27 = vrot.slane %v332_v24, %v590_v4 }
 0x103   :  { %v366_v30 = vrot.slane %v357_v25, %v590_v4 }
 0x105   :  { %v335_v26 = vpop.xlane.xlu0 %334 }
 0x106   :  { %v347_v28 = vrot.slane %v335_v26, %v590_v4  ;;  %v360_v29 = vpop.xlane.xlu1 %359 }
 0x107   :  { %v370_v31 = vrot.slane %v360_v29, %v590_v4 }
 0x108   :  { %v349_v32 = vsel %vm348_vm6, %v347_v28, %v343_v27 }
 0x109   :  { %v382_v33 = vpop.xlane.xlu0 %381  ;;  %352 = vst.msk [vmem:[#allocation10] sm:$0x3] %vm351_vm7, %v349_v32  ;;  %v371_v34 = vsel %vm348_vm6, %v370_v31, %v366_v30 }
 0x10a   :  { %v385_v35 = vrot.slane %v382_v33, 7  ;;  %v379_v36 = vpop.xlane.xlu1 %378 }
 0x10b   :  { %505 = shalt.err (!%p502_p0)
}
 0x10c   :  { %399 = dma.vmem_to_hbm [thread:$0]  %s397_s1, 32, %s700_s2, [#allocation7]   ;;  %373 = vst.msk [vmem:[#allocation11] sm:$0x3] %vm351_vm7, %v371_v34 }
 0x10d   :  { %s514_s6 = scalar_lea.vmem %s407_s28, 32  ;;  %p519_p2 = scmp.lt.s32.totalorder %s407_s28, %s407_s28 }
 0x10e   :  { %p515_p1 = scmp.ne.s32.totalorder %s407_s28, %s514_s6  ;;  %p520_p3 = scmp.lt.s32.totalorder %s514_s6, %s514_s6 }
 0x110   :  { %p521_p4 = por %p520_p3, %p519_p2 }
 0x112   :  { %p522_p5 = pnand %p521_p4, %p515_p1 }
 0x114   :  { %525 = shalt.err (!%p522_p5)
}
 0x115   :  { %409 = dma.vmem_to_hbm [thread:$0]  %s407_s28, 32, %s701_s3, [#allocation12]   ;;  %v386_v4 = vsel %vm348_vm6, %v385_v35, %v379_v36 }
 0x116   :  { %389 = vst.msk [vmem:[%s702_s4] sm:$0x3] %vm388_vm8, %v386_v4 }
 0x117   :  { %538 = dma.done.wait [#allocation7], 32  }
 0x118   :  { %539 = vsyncadd [#allocation7], 4294967264 }
 0x119   :  { %540 = dma.done.wait [#allocation12], 32  }
 0x11a   :  { %541 = vsyncadd [#allocation12], 4294967264 }
 0x11b   :  { %420 = vsyncpa [#allocation6], 1 }
 0x11c   :  { %421 = vsyncpa [#allocation9], 1 }
 0x11d   :  { %422 = vsyncpa [#allocation7], 1 }
 0x11e   :  { %423 = vsyncpa [#allocation12], 1 }

</bundles_post_ra>
